<compile_context>
chip_gen: v7x
topology: tpu7x:2x2x1
jax: 0.10.0
libtpu: 0.0.40
codegen_flags: <defaults>
</compile_context>

<pallas_src>
import functools

import jax
import jax.numpy as jnp
from jax.experimental import pallas as pl
from jax.experimental.pallas import tpu as pltpu


def _round_up(x: int, m: int) -> int:
    return ((x + m - 1) // m) * m


def linear_kernel(x_ref, w_ref, b_ref, o_ref, acc_ref):
    """One (tm, tn) output tile; accumulates in f32 over the K grid axis."""
    k = pl.program_id(2)

    @pl.when(k == 0)
    def _init():
        acc_ref[...] = jnp.zeros_like(acc_ref)

    # Plain NN contraction: x tile (tm, tk) @ W^T tile (tk, tn) -> MXU, f32 acc.
    acc_ref[...] += jnp.dot(
        x_ref[...], w_ref[...], preferred_element_type=jnp.float32
    )

    @pl.when(k == pl.num_programs(2) - 1)
    def _finalize():
        # Bias (already f32) added once, as the epilogue on the final K step.
        o_ref[...] = (acc_ref[...] + b_ref[...]).astype(o_ref.dtype)


@functools.partial(
    jax.jit,
    static_argnames=("n_out", "tm_cap", "tn", "tk", "sub", "compute_dtype"),
)
def _linear_forward(x, w_padded, b_padded, *, n_out, tm_cap, tn, tk, sub,
                    compute_dtype):
    """y = x @ W^T + b with W pre-transposed/padded to (K_pad, N_pad)."""
    B, K = x.shape
    K_pad, N_pad = w_padded.shape
    out_dtype = x.dtype

    # M tile: sublane-aligned for the compute dtype, capped; for skinny
    # batches this is a single resident M block (x read once).
    tm = min(tm_cap, _round_up(B, sub))
    M_pad = _round_up(B, tm)

    # Cast activations to the MXU-native dtype and pad (zeros are matmul
    # neutral; padding is sliced off below).  Only x is padded per call.
    x_c = x.astype(compute_dtype)
    if (M_pad, K_pad) != (B, K):
        x_c = jnp.pad(x_c, ((0, M_pad - B), (0, K_pad - K)))

    grid = (M_pad // tm, N_pad // tn, K_pad // tk)

    # Skinny-batch shapes are weight-HBM bound: deepen the weight pipeline
    # when M is a single block and there are enough weight tiles to stream.
    w_spec_kwargs = {}
    if grid[0] == 1 and grid[1] * grid[2] >= 3:
        w_spec_kwargs["pipeline_mode"] = pl.Buffered(3)
    w_spec = pl.BlockSpec((tk, tn), lambda i, j, k: (k, j), **w_spec_kwargs)

    itemsize = jnp.dtype(compute_dtype).itemsize
    bytes_accessed = (
        M_pad * K_pad * itemsize * grid[1]      # x re-streamed per N block
        + K_pad * N_pad * itemsize * grid[0]    # W re-streamed per M block
        + N_pad * 4                             # bias
        + M_pad * N_pad * jnp.dtype(out_dtype).itemsize
    )
    cost = pl.CostEstimate(
        flops=2 * M_pad * N_pad * K_pad,
        transcendentals=0,
        bytes_accessed=int(bytes_accessed),
    )

    out = pl.pallas_call(
        linear_kernel,
        out_shape=jax.ShapeDtypeStruct((M_pad, N_pad), out_dtype),
        grid_spec=pltpu.PrefetchScalarGridSpec(
            num_scalar_prefetch=0,
            grid=grid,
            in_specs=[
                pl.BlockSpec((tm, tk), lambda i, j, k: (i, k)),   # x
                w_spec,                                           # W^T (K_pad, N_pad)
                pl.BlockSpec((1, tn), lambda i, j, k: (0, j)),    # bias (f32)
            ],
            out_specs=pl.BlockSpec((tm, tn), lambda i, j, k: (i, j)),
            scratch_shapes=[pltpu.VMEM((tm, tn), jnp.float32)],
        ),
        compiler_params=pltpu.CompilerParams(
            dimension_semantics=("parallel", "parallel", "arbitrary"),
            # >= actual footprint (~13-19 MiB) on every gen, and <= 48 MiB so
            # it is safe on v7x's 64 MiB-per-TensorCore VMEM.
            vmem_limit_bytes=48 * 1024 * 1024,
        ),
        cost_estimate=cost,
    )(x_c, w_padded, b_padded)

    # Slice away lane/sublane padding.
    return out[:B, :n_out]


class PallasLinear:
    """Pallas equivalent of torch.nn.Linear(size_in, size_out).forward.

    Weight/bias preparation (transpose, pad, cast) happens once here, not per
    forward call.
    """

    def __init__(self, weight, bias, *, compute_dtype=jnp.bfloat16,
                 tm_cap=512, tn_cap=512, tk_cap=None):
        weight = jnp.asarray(weight)
        bias = jnp.asarray(bias)
        N, K = weight.shape          # PyTorch layout: (size_out, size_in)
        assert bias.shape == (N,)

        if tk_cap is None:
            tk_cap = 2048 if compute_dtype == jnp.bfloat16 else 1024
        self.compute_dtype = compute_dtype
        self.sub = 16 if compute_dtype == jnp.bfloat16 else 8
        self.tm_cap = tm_cap
        self.n_out = N

        tn = min(tn_cap, _round_up(N, 128))
        tk = min(tk_cap, _round_up(K, 128))
        # v7x has 2 TensorCores sharded over "parallel" grid axes: if N would
        # be a single block (common with skinny batches where M is also a
        # single block), split N so at least 2 parallel blocks exist.
        n_pad128 = _round_up(N, 128)
        if n_pad128 // tn == 1 and n_pad128 >= 256:
            tn = _round_up(n_pad128 // 2, 128)
        self.tn, self.tk = tn, tk

        N_pad = _round_up(N, tn)
        K_pad = _round_up(K, tk)

        # One-time prep: W -> W^T (K, N), zero-pad, cast to compute dtype.
        w_t = jnp.pad(weight.T, ((0, K_pad - K), (0, N_pad - N)))
        self.w_padded = w_t.astype(compute_dtype)
        self.b_padded = jnp.pad(
            bias.astype(jnp.float32).reshape(1, N), ((0, 0), (0, N_pad - N))
        )

    def __call__(self, x):
        return _linear_forward(
            x, self.w_padded, self.b_padded,
            n_out=self.n_out, tm_cap=self.tm_cap, tn=self.tn, tk=self.tk,
            sub=self.sub, compute_dtype=self.compute_dtype,
        )


if __name__ == "__main__":
    key = jax.random.PRNGKey(0)

    # --- Toy shape implied by the module: size_in=32, size_out=16, batch=8.
    size_in, size_out, batch = 32, 16, 8
    kx, kw, kb = jax.random.split(key, 3)
    bound = 1.0 / jnp.sqrt(jnp.float32(size_in))
    weight = jax.random.uniform(kw, (size_out, size_in), jnp.float32, -bound, bound)
    bias = jax.random.uniform(kb, (size_out,), jnp.float32, -bound, bound)
    x = jax.random.normal(kx, (batch, size_in), jnp.float32)

    lin = PallasLinear(weight, bias)          # bf16 compute, f32 accumulate
    y = lin(x)
    jax.block_until_ready(y)
    # Reference with the same bf16 input rounding (accumulation in f32).
    y_ref = (x.astype(jnp.bfloat16).astype(jnp.float32)
             @ weight.astype(jnp.bfloat16).astype(jnp.float32).T) + bias
    assert y.shape == (batch, size_out)
    assert jnp.allclose(y, y_ref, atol=2e-3, rtol=2e-3)

    # --- Larger non-aligned shape exercising N-splitting + K padding.
    B2, K2, N2 = 256, 640, 384
    k1, k2, k3 = jax.random.split(jax.random.PRNGKey(1), 3)
    bound2 = 1.0 / jnp.sqrt(jnp.float32(K2))
    w2 = jax.random.uniform(k2, (N2, K2), jnp.float32, -bound2, bound2)
    b2 = jax.random.uniform(k3, (N2,), jnp.float32, -bound2, bound2)
    x2 = jax.random.normal(k1, (B2, K2), jnp.float32)

    lin2 = PallasLinear(w2, b2)
    y2 = lin2(x2)
    jax.block_until_ready(y2)
    y2_ref = (x2.astype(jnp.bfloat16).astype(jnp.float32)
              @ w2.astype(jnp.bfloat16).astype(jnp.float32).T) + b2
    assert y2.shape == (B2, N2)
    assert jnp.allclose(y2, y2_ref, atol=5e-3, rtol=5e-3)

    # --- Exact f32 path is also available (compute_dtype=jnp.float32).
    lin_f32 = PallasLinear(weight, bias, compute_dtype=jnp.float32)
    y_f32 = lin_f32(x)
    jax.block_until_ready(y_f32)
    assert jnp.allclose(y_f32, x @ weight.T + bias, atol=1e-5, rtol=1e-5)

    # TODO(synk): CrossEntropyLoss / Adam in the module are training-only and
    # not part of forward(); they are intentionally not implemented as kernels.
    # TODO(synk): optional v7x fp8 weight path (per-tile scales) not implemented.
    print("KERNEL_OK")
</pallas_src>

<mosaic_0001>
module attributes {stable_mosaic.version = 11 : i64} {
  func.func @linear_kernel(%arg0: i32, %arg1: i32, %arg2: i32, %arg3: memref<16x128xbf16, #tpu.memory_space<vmem>>, %arg4: memref<128x128xbf16, #tpu.memory_space<vmem>>, %arg5: memref<1x128xf32, #tpu.memory_space<vmem>>, %arg6: memref<16x128xf32, #tpu.memory_space<vmem>>, %arg7: memref<16x128xf32, #tpu.memory_space<vmem>>) attributes {dimension_semantics = [#tpu.dimension_semantics<parallel>, #tpu.dimension_semantics<parallel>, #tpu.dimension_semantics<arbitrary>], iteration_bounds = array<i64: 1, 1, 1>, scalar_prefetch = 0 : i64, scratch_operands = 1 : i64, tpu.core_type = #tpu.core_type<tc>, window_params = [{transform_indices = @transform_0, window_bounds = array<i64: 16, 128>}, {transform_indices = @transform_1, window_bounds = array<i64: 128, 128>}, {transform_indices = @transform_2, window_bounds = array<i64: 1, 128>}, {transform_indices = @transform_3, window_bounds = array<i64: 16, 128>}]} {
    %c0_i32 = arith.constant 0 : i32
    %0 = arith.cmpi eq, %arg2, %c0_i32 : i32
    %1 = arith.extui %0 : i1 to i32
    %c0_i32_0 = arith.constant 0 : i32
    %2 = arith.cmpi ne, %1, %c0_i32_0 : i32
    scf.if %2 {
      %cst_10 = arith.constant 0.000000e+00 : f32
      %12 = vector.broadcast %cst_10 : f32 to vector<16x128xf32>
      %c0_11 = arith.constant 0 : index
      %c0_12 = arith.constant 0 : index
      %13 = vector.load %arg7[%c0_11, %c0_12] : memref<16x128xf32, #tpu.memory_space<vmem>>, vector<16x128xf32>
      tpu.vector_store %arg7[%c0_11, %c0_12], %12 {strides = array<i32>} : memref<16x128xf32, #tpu.memory_space<vmem>>, vector<16x128xf32>,
    } else {
    }
    %c0 = arith.constant 0 : index
    %c0_1 = arith.constant 0 : index
    %3 = vector.load %arg7[%c0, %c0_1] : memref<16x128xf32, #tpu.memory_space<vmem>>, vector<16x128xf32>
    %c0_2 = arith.constant 0 : index
    %c0_3 = arith.constant 0 : index
    %4 = vector.load %arg3[%c0_2, %c0_3] : memref<16x128xbf16, #tpu.memory_space<vmem>>, vector<16x128xbf16>
    %c0_4 = arith.constant 0 : index
    %c0_5 = arith.constant 0 : index
    %5 = vector.load %arg4[%c0_4, %c0_5] : memref<128x128xbf16, #tpu.memory_space<vmem>>, vector<128x128xbf16>
    %cst = arith.constant dense<0.000000e+00> : vector<16x128xf32>
    %6 = tpu.matmul %4, %5, %cst {dimension_numbers = #tpu.dot_dimension_numbers<[1], [0], [0], [1], [0, 0, 1, 1], [], []>} : vector<16x128xbf16>, vector<128x128xbf16>, vector<16x128xf32> -> vector<16x128xf32>
    %7 = arith.addf %3, %6 : vector<16x128xf32>
    %c0_6 = arith.constant 0 : index
    %c0_7 = arith.constant 0 : index
    %8 = vector.load %arg7[%c0_6, %c0_7] : memref<16x128xf32, #tpu.memory_space<vmem>>, vector<16x128xf32>
    tpu.vector_store %arg7[%c0_6, %c0_7], %7 {strides = array<i32>} : memref<16x128xf32, #tpu.memory_space<vmem>>, vector<16x128xf32>,
    %c0_i32_8 = arith.constant 0 : i32
    %9 = arith.cmpi eq, %arg2, %c0_i32_8 : i32
    %10 = arith.extui %9 : i1 to i32
    %c0_i32_9 = arith.constant 0 : i32
    %11 = arith.cmpi ne, %10, %c0_i32_9 : i32
    scf.if %11 {
      %c0_10 = arith.constant 0 : index
      %c0_11 = arith.constant 0 : index
      %12 = vector.load %arg7[%c0_10, %c0_11] : memref<16x128xf32, #tpu.memory_space<vmem>>, vector<16x128xf32>
      %c0_12 = arith.constant 0 : index
      %c0_13 = arith.constant 0 : index
      %13 = vector.load %arg5[%c0_12, %c0_13] : memref<1x128xf32, #tpu.memory_space<vmem>>, vector<1x128xf32>
      %14 = vector.broadcast %13 : vector<1x128xf32> to vector<16x128xf32>
      %15 = arith.addf %12, %14 : vector<16x128xf32>
      %c0_14 = arith.constant 0 : index
      %c0_15 = arith.constant 0 : index
      %16 = vector.load %arg6[%c0_14, %c0_15] : memref<16x128xf32, #tpu.memory_space<vmem>>, vector<16x128xf32>
      tpu.vector_store %arg6[%c0_14, %c0_15], %15 {strides = array<i32>} : memref<16x128xf32, #tpu.memory_space<vmem>>, vector<16x128xf32>,
    } else {
    }
    return
  }
  func.func @transform_0(%arg0: i32, %arg1: i32, %arg2: i32) -> (i32, i32) {
    %c0_i32 = arith.constant 0 : i32
    return %arg0, %arg2 : i32, i32
  }
  func.func @transform_1(%arg0: i32, %arg1: i32, %arg2: i32) -> (i32, i32) {
    %c0_i32 = arith.constant 0 : i32
    return %arg2, %arg1 : i32, i32
  }
  func.func @transform_2(%arg0: i32, %arg1: i32, %arg2: i32) -> (i32, i32) {
    %c0_i32 = arith.constant 0 : i32
    %c0_i32_0 = arith.constant 0 : i32
    return %c0_i32, %arg1 : i32, i32
  }
  func.func @transform_3(%arg0: i32, %arg1: i32, %arg2: i32) -> (i32, i32) {
    %c0_i32 = arith.constant 0 : i32
    return %arg0, %arg1 : i32, i32
  }
}

</mosaic_0001>

<bundles_post_ra>
// kernel: _linear_forward.1
= control target key start
LH: loop header
LB: loop body
LE: loop exit
PB: predicated region body
PF: predicated region fallthrough
CT: control target
= control target key end

     0   :  { %8 = vsyncpa [#allocation4], 0  ;;  %s252_s12 = smov [#allocation3]   ;;  %s301_s0 = inlined_call_operand.vmem [shape: bf16[16,128], index: 0, kind: input, shape index: {}]   ;;  %s302_s1 = inlined_call_operand.hbm [shape: bf16[128,128], index: 1, kind: input, shape index: {}]   ;;  %s303_s2 = inlined_call_operand.vmem [shape: f32[1,128], index: 2, kind: input, shape index: {}]   ;;  %s304_s3 = inlined_call_operand.vmem [shape: f32[16,128], index: 3, kind: output, shape index: {}]  }
   0x1   :  { %s16_s13 = sshll.u32 %s252_s12, 4  ;;  %s228_s16 = scalar_lea.hbm %s302_s1, 1024  ;;  %s17_s13 = int_to_ptr.vmem [resolvable:$true] %s16_s13 }
   0x2   :  { %p229_p0 = scmp.ne.s32.totalorder %s302_s1, %s228_s16  ;;  %p232_p1 = scmp.lt.u32.totalorder %s228_s16, %s302_s1 }
   0x4   :  { %p234_p2 = pnand %p232_p1, %p229_p0 }
   0x6   :  { %237 = shalt.err (!%p234_p2)
}
   0x7   :  { %s238_s21 = scalar_lea.vmem %s17_s13, 1024  ;;  %p243_p4 = scmp.lt.s32.totalorder %s17_s13, %s17_s13 }
   0x8   :  { %p239_p3 = scmp.ne.s32.totalorder %s17_s13, %s238_s21  ;;  %p244_p5 = scmp.lt.s32.totalorder %s238_s21, %s238_s21 }
   0xa   :  { %p245_p6 = por %p244_p5, %p243_p4 }
   0xc   :  { %p246_p7 = pnand %p245_p6, %p239_p3 }
   0xe   :  { %249 = shalt.err (!%p246_p7)
}
   0xf   :  { %s253_s22 = smov 64   ;;  %s254_s23 = smov 4  }
  0x10   :  { %22 = dma.hbm_to_vmem [thread:$0]  %s302_s1, 1024, %s17_s13, [#allocation4], %s253_s22, %s253_s22, %s254_s23  }
  0x11   :  { %250 = dma.done.wait [#allocation4], 1024  }
  0x12   :  { %251 = vsyncadd [#allocation4], 4294966272  ;;  %v255_v0 = vmov 0.0   ;;  %vm256_vm0 = vmmov 0   ;;  %v219_v1 = vld [vmem:[#allocation3] sm:$0xff]   ;;  %v220_v2 = vld [vmem:[#allocation3 + $0x8] sm:$0xff]  }
  0x13   :  { %194 = vmatprep.subr.bf16.mxu0 %v255_v0  ;;  %210 = vmatprep.mubr.msk.bf16.mxu0 %vm256_vm0, %v255_v0  ;;  %v221_v3 = vld [vmem:[#allocation3 + $0x10] sm:$0xff]   ;;  %v222_v4 = vld [vmem:[#allocation3 + $0x18] sm:$0xff]   ;;  %v223_v5 = vld [vmem:[#allocation3 + $0x20] sm:$0xff]  }
  0x14   :  { %195 = vmatpush3.bf16.msra.mxu0 %v219_v1  ;;  %v224_v6 = vld [vmem:[#allocation3 + $0x28] sm:$0xff]   ;;  %v225_v7 = vld [vmem:[#allocation3 + $0x30] sm:$0xff]   ;;  %v226_v8 = vld [vmem:[#allocation3 + $0x38] sm:$0xff]  }
  0x15   :  { %196 = vmatprep.subr.bf16.mxu0 %v255_v0  ;;  %v227_v9 = vld [vmem:[%s301_s0] sm:$0xff]  }
  0x16   :  { %v184_v10 = vld [vmem:[%s303_s2] ss:$0 sm:$0xff] }
  0x18   :  { %197 = vmatpush3.bf16.msra.mxu0 %v220_v2 }
  0x19   :  { %198 = vmatprep.subr.bf16.mxu0 %v255_v0 }
  0x1c   :  { %199 = vmatpush3.bf16.msra.mxu0 %v221_v3 }
  0x1d   :  { %200 = vmatprep.subr.bf16.mxu0 %v255_v0 }
  0x20   :  { %201 = vmatpush3.bf16.msra.mxu0 %v222_v4 }
  0x21   :  { %202 = vmatprep.subr.bf16.mxu0 %v255_v0 }
  0x24   :  { %203 = vmatpush3.bf16.msra.mxu0 %v223_v5 }
  0x25   :  { %204 = vmatprep.subr.bf16.mxu0 %v255_v0 }
  0x28   :  { %205 = vmatpush3.bf16.msra.mxu0 %v224_v6 }
  0x29   :  { %206 = vmatprep.subr.bf16.mxu0 %v255_v0 }
  0x2c   :  { %207 = vmatpush3.bf16.msra.mxu0 %v225_v7 }
  0x2d   :  { %208 = vmatprep.subr.bf16.mxu0 %v255_v0 }
  0x30   :  { %209 = vmatpush3.bf16.msra.mxu0 %v226_v8 }
  0x33   :  { %211 = vmatmul.mubr.bf16.vlgmr.msra.gmra.mrb[0].mxu0 %v227_v9 }
 0x106   :  { %v143_v11 = vpop.f32.mrb[0].mxu0 }
 0x107   :  { %v166_v12 = vadd.f32 %v184_v10, %v143_v11  ;;  %v212_v13 = vpop.f32.mrb[1].mxu0 }
 0x108   :  { %v146_v14 = vpop.f32.mrb[2].mxu0 }
 0x109   :  { %168 = vst [vmem:[%s304_s3] sm:$0xff] %v166_v12  ;;  %v167_v15 = vadd.f32 %v184_v10, %v146_v14  ;;  %v213_v16 = vpop.f32.mrb[3].mxu0 }
 0x10b   :  { %169 = vst [vmem:[%s304_s3 + $0x8] sm:$0xff] %v167_v15 }
 0x10c   :  { %174 = vsyncpa [#allocation4], 1 }

</bundles_post_ra>
